<compile_context>
chip_gen: v5e
topology: v5e:2x2
jax: 0.10.0
libtpu: 0.0.40
codegen_flags: <defaults>
</compile_context>

<pallas_src>
import jax
import jax.numpy as jnp
from jax import lax
from jax.experimental import pallas as pl
from jax.experimental.pallas import tpu as pltpu

NEG_SLOPE = 0.2  # discAct() = LeakyReLU(0.2)


def _conv_mm_lrelu_kernel(a_ref, w_ref, o_ref):
    # a_ref: (K, TILE_HW)    bf16 im2col slab (HW on lanes, multiple of 128)
    # w_ref: (K, Cout)       bf16 weight, lane-dense, resident across the grid
    # o_ref: (Cout, TILE_HW) output tile (NCHW-flat)
    acc = lax.dot_general(
        w_ref[...], a_ref[...],
        dimension_numbers=(((0,), (0,)), ((), ())),   # contract K with K
        preferred_element_type=jnp.float32)           # MXU, f32 accumulation
    o_ref[...] = jnp.maximum(acc, NEG_SLOPE * acc).astype(o_ref.dtype)


def _pick_hw_tile(hw, n_batch, bytes_per_col, vmem_budget=24 << 20):
    """Largest multiple-of-128 divisor of hw whose double-buffered working set
    fits `vmem_budget`, while keeping >= 2 total grid steps so both v7x
    TensorCores get work (irrelevant but harmless on v5e/v6e)."""
    if hw % 128 != 0:
        # Non-lane-aligned size: fall back to a single full block.
        # TODO(synk): masked-vst / huge-block cliff for odd sizes; never hit by
        # the 64/128/256 branches of this module.
        return hw
    t = hw
    while t > 128 and (hw % t != 0 or t * bytes_per_col > vmem_budget):
        t -= 128
    if n_batch * (hw // t) < 2 and (t // 2) % 128 == 0 and hw % (t // 2) == 0:
        t //= 2  # N == 1: split HW so a v7x chip still sees 2 parallel steps
    return t


def conv3x3_s2_lrelu_pallas(x_nchw, weight_oihw, out_dtype=jnp.bfloat16):
    """Conv2d(kernel=3, stride=2, padding=1, bias=False) + LeakyReLU(0.2).

    Intentional precision choice: bf16 inputs to the MXU, f32 accumulation,
    bf16 output (use out_dtype=jnp.float32 for a full-precision output)."""
    N, Cin, H, W = x_nchw.shape
    Cout = weight_oihw.shape[0]
    assert H % 2 == 0 and W % 2 == 0, "even spatial sizes (64/128/256 branches)"
    Ho, Wo = H // 2, W // 2
    K = 9 * Cin
    HW = Ho * Wo
    out_itemsize = jnp.dtype(out_dtype).itemsize
    # Double-buffered VMEM bytes per lane-column of a tile (A input + output).
    bytes_per_col = 2 * (K * 2 + Cout * out_itemsize)
    tile_hw = _pick_hw_tile(HW, N, bytes_per_col)

    # --- XLA-side glue: im2col built directly in the transposed (K, HW) layout.
    # TODO(synk): fusing the patch build into the kernel would save one small
    # HBM round trip of A (~55 KB/image), but the in-kernel (Ho,Wo)->HW flatten
    # is a lane relayout Mosaic does not lower cleanly, so it stays as XLA glue.
    xp = jnp.pad(x_nchw, ((0, 0), (0, 0), (1, 1), (1, 1)))
    taps = []
    for ky in range(3):
        for kx in range(3):
            taps.append(xp[:, :, ky:ky + 2 * Ho:2, kx:kx + 2 * Wo:2])  # (N,Cin,Ho,Wo)
    a = jnp.stack(taps, axis=2).reshape(N, K, HW).astype(jnp.bfloat16)  # (N,K,HW)
    # OIHW -> (Cout, K) -> (K, Cout): K order (cin, ky, kx) matches the stack
    # order above; (K, Cout) keeps the resident weight lane-dense (Cout lanes).
    w = weight_oihw.reshape(Cout, K).T.astype(jnp.bfloat16)

    cost = pl.CostEstimate(
        flops=2 * N * HW * K * Cout,
        transcendentals=0,
        bytes_accessed=a.size * 2 + w.size * 2 + N * Cout * HW * out_itemsize,
    )

    out = pl.pallas_call(
        _conv_mm_lrelu_kernel,
        out_shape=jax.ShapeDtypeStruct((N, Cout, HW), out_dtype),
        grid_spec=pltpu.PrefetchScalarGridSpec(
            num_scalar_prefetch=0,
            grid=(N, HW // tile_hw),
            in_specs=[
                pl.BlockSpec((pl.Squeezed(), K, tile_hw), lambda n, h: (n, 0, h)),
                pl.BlockSpec((K, Cout), lambda n, h: (0, 0)),
            ],
            out_specs=pl.BlockSpec((pl.Squeezed(), Cout, tile_hw),
                                   lambda n, h: (n, 0, h)),
        ),
        compiler_params=pltpu.CompilerParams(
            dimension_semantics=("parallel", "parallel")),
        cost_estimate=cost,
    )(a, w)

    # (N, Cout, HW) is already NCHW-flat — reshape only, no transpose.
    return out.reshape(N, Cout, Ho, Wo)


@jax.jit
def shared_image_down_forward(x_nchw, params):
    # input_size == 64 branch of sharedImageDown.__init__:
    #   conv_norm(num_chan, 128, stride=2, activation=LeakyReLU(0.2),
    #             use_norm=False, use_bias=False)
    out = conv3x3_s2_lrelu_pallas(x_nchw, params["conv0_w"])
    # TODO(synk): self.shared_block is an externally injected module (None in
    # this config); treated as identity since its definition is not part of
    # this module.
    return out


if __name__ == "__main__":
    key = jax.random.PRNGKey(0)
    k_x, k_w = jax.random.split(key)

    N, num_chan, input_size = 2, 3, 64
    cur_dim = 128  # hard-coded in the PyTorch module
    x = jax.random.normal(k_x, (N, num_chan, input_size, input_size),
                          dtype=jnp.float32)
    params = {
        "conv0_w": 0.05 * jax.random.normal(
            k_w, (cur_dim, num_chan, 3, 3), dtype=jnp.float32),
    }

    out = shared_image_down_forward(x, params)
    out = jax.block_until_ready(out)
    assert out.shape == (N, cur_dim, input_size // 2, input_size // 2)

    # Reference: XLA conv with the same bf16 input quantization + f32
    # accumulation (semantics of PyTorch Conv2d NCHW/OIHW, stride 2, pad 1,
    # no bias), followed by LeakyReLU(0.2).
    ref = lax.conv_general_dilated(
        x.astype(jnp.bfloat16), params["conv0_w"].astype(jnp.bfloat16),
        window_strides=(2, 2), padding=((1, 1), (1, 1)),
        dimension_numbers=("NCHW", "OIHW", "NCHW"),
        preferred_element_type=jnp.float32)
    ref = jnp.maximum(ref, NEG_SLOPE * ref)
    if not jnp.allclose(out.astype(jnp.float32), ref, atol=2e-2, rtol=2e-2):
        raise AssertionError("Pallas conv output mismatch vs reference")

    print("KERNEL_OK")
</pallas_src>

<mosaic_0001>
module attributes {stable_mosaic.version = 11 : i64} {
  func.func @_conv_mm_lrelu_kernel(%arg0: i32, %arg1: i32, %arg2: memref<1x27x1024xbf16, #tpu.memory_space<vmem>>, %arg3: memref<27x128xbf16, #tpu.memory_space<vmem>>, %arg4: memref<1x128x1024xbf16, #tpu.memory_space<vmem>>) attributes {dimension_semantics = [#tpu.dimension_semantics<parallel>, #tpu.dimension_semantics<parallel>], iteration_bounds = array<i64: 2, 1>, scalar_prefetch = 0 : i64, scratch_operands = 0 : i64, tpu.core_type = #tpu.core_type<tc>, window_params = [{transform_indices = @transform_0, window_bounds = array<i64: 1, 27, 1024>}, {pipeline_mode = #tpu.pipeline_mode<synchronous>, transform_indices = @transform_1, window_bounds = array<i64: 27, 128>}, {transform_indices = @transform_2, window_bounds = array<i64: 1, 128, 1024>}]} {
    %c0 = arith.constant 0 : index
    %c0_0 = arith.constant 0 : index
    %0 = vector.load %arg3[%c0, %c0_0] : memref<27x128xbf16, #tpu.memory_space<vmem>>, vector<27x128xbf16>
    %c0_1 = arith.constant 0 : index
    %c0_2 = arith.constant 0 : index
    %c0_3 = arith.constant 0 : index
    %1 = vector.load %arg2[%c0_1, %c0_2, %c0_3] : memref<1x27x1024xbf16, #tpu.memory_space<vmem>>, vector<1x27x1024xbf16>
    %2 = vector.shape_cast %1 : vector<1x27x1024xbf16> to vector<27x1024xbf16>
    %cst = arith.constant dense<0.000000e+00> : vector<128x1024xf32>
    %3 = tpu.matmul %0, %2, %cst {dimension_numbers = #tpu.dot_dimension_numbers<[0], [0], [1], [1], [0, 1, 1, 1], [], []>} : vector<27x128xbf16>, vector<27x1024xbf16>, vector<128x1024xf32> -> vector<128x1024xf32>
    %cst_4 = arith.constant 2.000000e-01 : f32
    %4 = vector.broadcast %cst_4 : f32 to vector<128x1024xf32>
    %5 = arith.mulf %4, %3 : vector<128x1024xf32>
    %6 = arith.maximumf %3, %5 : vector<128x1024xf32>
    %7 = arith.truncf %6 : vector<128x1024xf32> to vector<128x1024xbf16>
    %c0_5 = arith.constant 0 : index
    %c0_6 = arith.constant 0 : index
    %c0_7 = arith.constant 0 : index
    %8 = vector.load %arg4[%c0_5, %c0_6, %c0_7] : memref<1x128x1024xbf16, #tpu.memory_space<vmem>>, vector<1x128x1024xbf16>
    %9 = vector.shape_cast %8 : vector<1x128x1024xbf16> to vector<128x1024xbf16>
    %10 = vector.shape_cast %7 : vector<128x1024xbf16> to vector<1x128x1024xbf16>
    tpu.vector_store %arg4[%c0_5, %c0_6, %c0_7], %10 {strides = array<i32>} : memref<1x128x1024xbf16, #tpu.memory_space<vmem>>, vector<1x128x1024xbf16>,
    return
  }
  func.func @transform_0(%arg0: i32, %arg1: i32) -> (i32, i32, i32) {
    %c0_i32 = arith.constant 0 : i32
    %c0_i32_0 = arith.constant 0 : i32
    return %arg0, %c0_i32, %arg1 : i32, i32, i32
  }
  func.func @transform_1(%arg0: i32, %arg1: i32) -> (i32, i32) {
    %c0_i32 = arith.constant 0 : i32
    %c0_i32_0 = arith.constant 0 : i32
    %c0_i32_1 = arith.constant 0 : i32
    return %c0_i32, %c0_i32_0 : i32, i32
  }
  func.func @transform_2(%arg0: i32, %arg1: i32) -> (i32, i32, i32) {
    %c0_i32 = arith.constant 0 : i32
    %c0_i32_0 = arith.constant 0 : i32
    return %arg0, %c0_i32, %arg1 : i32, i32, i32
  }
}

</mosaic_0001>

<bundles_post_ra>
// kernel: shared_image_down_forward.1
= control target key start
LH: loop header
LB: loop body
LE: loop exit
PB: predicated region body
PF: predicated region fallthrough
CT: control target
= control target key end

     0   :  { %s1453_s9 = smov 0   ;;  %s1455_s10 = smov 0   ;;  %s1743_s0 = inlined_call_operand.vmem [shape: bf16[2,27,1024], index: 0, kind: input, shape index: {}]   ;;  %s1744_s1 = inlined_call_operand.vmem [shape: bf16[27,128], index: 1, kind: input, shape index: {}]   ;;  %s1745_s2 = inlined_call_operand.vmem [shape: bf16[2,128,1024], index: 2, kind: output, shape index: {}]  }
   0x1   :  { %s1457_s11 = smov 0  }
   0x2 LB: > { %s24_s12 = sadd.s32 1, %s1431_s10  ;;  %p1224_p0 = scmp.ge.s32.totalorder %s1435_s11, 1  ;;  %s1435_s11 = sphi %s1457_s11, %s12_s11   ;;  %s1431_s10 = sphi %s1455_s10, %s1747_s10   ;;  %s1427_s9 = sphi %s1453_s9, %s1746_s9  }
   0x3   : > { %p26_p1 = scmp.ge.s32.totalorder %s24_s12, 2  ;;  %p133_p2 = scmp.lt.s32.totalorder %s1435_s11, 3 }
   0x5   : > { %s1749_s12 = smov (%p26_p1, %s24_s12), 0  ;;  %p134_p3 = pnand %p1224_p0, %p133_p2 }
   0x6   : > { %p164_p4 = scmp.lt.s32.totalorder (!%p134_p3), %s1427_s9, 1 }
   0x7   : > { %137 = sbr.rel (%p134_p3) target bundleno = 574 (0x23e), region = 28 }
   0xc   : > { %v1369_v0 = vld [vmem:[%s1744_s1] sm:$0xff]  ;;  %vm329_vm0 = vcmask 1044480   ;;  %s1751_s9 = smov (!%p164_p4, %s1427_s9), 1  ;;  %vm330_vm1 = vcmask 1045504   ;;  %v1437_v1 = vmov 65535   ;;  %vm304_vm2 = vcmask 220160  }
   0xd   : > { %216 = vxpose.xlu0.c.b16.start [1/2] (short) %v1369_v0, 128  ;;  %v331_v2 = vsel %vm329_vm0, 4294967295, %v1437_v1  ;;  %s1367_s15 = sshll.u32 %s1751_s9, 7  ;;  %v1235_v26 = vld [vmem:[%s1744_s1 + $0x8] sm:$0xf]  ;;  %v1370_v27 = vld [vmem:[%s1744_s1 + $0x8] sm:$0x30] }
   0xe   : > { %s1480_s18 = scalar_lea.vmem %s1743_s0, %s1367_s15  ;;  %v332_v3 = vsel %vm330_vm1, %v331_v2, 0  ;;  %v1236_v34 = vor.u32 %v1370_v27, %v1235_v26  ;;  %s1368_s23 = sshll.u32 %s1751_s9, 9 }
   0xf   : > { %v1271_v4 = vld [vmem:[%s1480_s18 + $0x40] sm:$0xf]  ;;  %v1379_v6 = vld [vmem:[%s1480_s18 + $0x44] sm:$0xf]  ;;  %v1279_v9 = vld [vmem:[%s1480_s18 + $0x48] sm:$0xf]  ;;  %s1608_s26 = scalar_lea.vmem %s1745_s2, %s1368_s23 }
  0x10   : > { %v1383_v5 = vld [vmem:[%s1480_s18 + $0x5c] sm:$0x30]  ;;  %v1273_v8 = vld [vmem:[%s1480_s18 + $0x60] sm:$0x30]  ;;  %v1384_v10 = vld [vmem:[%s1480_s18 + $0x64] sm:$0x30] }
  0x11   : > { %v1272_v7 = vor.u32 %v1383_v5, %v1271_v4  ;;  %v1276_v11 = vor.u32 %v1379_v6, %v1273_v8  ;;  %v1280_v12 = vor.u32 %v1384_v10, %v1279_v9  ;;  %v1380_v13 = vld [vmem:[%s1480_s18 + $0x4c] sm:$0xf]  ;;  %v1239_v15 = vld [vmem:[%s1480_s18] sm:$0xf]  ;;  %v1371_v19 = vld [vmem:[%s1480_s18 + $0x4] sm:$0xf] }
  0x12   : > { %v1281_v14 = vld [vmem:[%s1480_s18 + $0x68] sm:$0x30]  ;;  %v1375_v18 = vld [vmem:[%s1480_s18 + $0x1c] sm:$0xf0]  ;;  %v1241_v20 = vld [vmem:[%s1480_s18 + $0x20] sm:$0xf0] }
  0x13   : > { %v334_v16 = vand.u32 %v1272_v7, %v332_v3  ;;  %v1284_v17 = vor.u32 %v1380_v13, %v1281_v14  ;;  %v337_v21 = vand.u32 %v1276_v11, %v332_v3  ;;  %v340_v22 = vand.u32 %v1280_v12, %v332_v3  ;;  %v1247_v23 = vld [vmem:[%s1480_s18 + $0x8] sm:$0xf]  ;;  %v1372_v25 = vld [vmem:[%s1480_s18 + $0xc] sm:$0xf]  ;;  %v1295_v35 = vld [vmem:[%s1480_s18 + $0x58] sm:$0xf] }
  0x14   : > { %v1376_v24 = vld [vmem:[%s1480_s18 + $0x24] sm:$0xf0]  ;;  %v1240_v29 = vor.u32 %v1375_v18, %v1239_v15  ;;  %v1249_v30 = vld [vmem:[%s1480_s18 + $0x28] sm:$0xf0]  ;;  %v1244_v31 = vor.u32 %v1371_v19, %v1241_v20  ;;  %v1386_v36 = vld [vmem:[%s1480_s18 + $0x74] sm:$0x30] }
  0x15   : > { %363 = vmatpush.bf16.msra.mxu0 %v334_v16  ;;  %v343_v28 = vand.u32 %v1284_v17, %v332_v3  ;;  %412 = vmatpush.bf16.msra.mxu1 %v337_v21  ;;  %v1248_v32 = vor.u32 %v1376_v24, %v1247_v23  ;;  %v1252_v33 = vor.u32 %v1372_v25, %v1249_v30  ;;  %v1382_v37 = vld [vmem:[%s1480_s18 + $0x5c] sm:$0xf]  ;;  %v1287_v40 = vld [vmem:[%s1480_s18 + $0x50] sm:$0xf]  ;;  %v1381_v44 = vld [vmem:[%s1480_s18 + $0x54] sm:$0xf] }
  0x16   : > { %461 = vmatpush.bf16.msra.mxu2 %v340_v22  ;;  %v1296_v38 = vor.u32 %v1386_v36, %v1295_v35  ;;  %v1297_v39 = vld [vmem:[%s1480_s18 + $0x78] sm:$0x30]  ;;  %v1385_v41 = vld [vmem:[%s1480_s18 + $0x6c] sm:$0x30]  ;;  %v1289_v45 = vld [vmem:[%s1480_s18 + $0x70] sm:$0x30] }
  0x17   : > { %510 = vmatpush.bf16.msra.mxu3 %v343_v28  ;;  %v1300_v42 = vor.u32 %v1382_v37, %v1297_v39  ;;  %v1288_v43 = vor.u32 %v1385_v41, %v1287_v40  ;;  %v1292_v47 = vor.u32 %v1381_v44, %v1289_v45  ;;  %v1263_v54 = vld [vmem:[%s1480_s18 + $0x18] sm:$0xf]  ;;  %v1374_v56 = vld [vmem:[%s1480_s18 + $0x1c] sm:$0xf]  ;;  %v1255_v59 = vld [vmem:[%s1480_s18 + $0x10] sm:$0xf] }
  0x18   : > { %v352_v46 = vand.u32 %v1296_v38, %v332_v3  ;;  %v1378_v55 = vld [vmem:[%s1480_s18 + $0x34] sm:$0xf0]  ;;  %v1265_v58 = vld [vmem:[%s1480_s18 + $0x38] sm:$0xf0]  ;;  %v1377_v60 = vld [vmem:[%s1480_s18 + $0x2c] sm:$0xf0] }
  0x19   : > { %364 = vmatpush.bf16.msra.mxu0 %v1240_v29  ;;  %413 = vmatpush.bf16.msra.mxu1 %v1244_v31  ;;  %v355_v48 = vand.u32 %v1300_v42, %v332_v3  ;;  %v346_v49 = vand.u32 %v1288_v43, %v332_v3  ;;  %v349_v50 = vand.u32 %v1292_v47, %v332_v3  ;;  %v1373_v63 = vld [vmem:[%s1480_s18 + $0x14] sm:$0xf] }
  0x1a   : > { %462 = vmatpush.bf16.msra.mxu2 %v1248_v32  ;;  %v1264_v57 = vor.u32 %v1378_v55, %v1263_v54  ;;  %v1268_v61 = vor.u32 %v1374_v56, %v1265_v58  ;;  %v1256_v62 = vor.u32 %v1377_v60, %v1255_v59  ;;  %v1257_v0 = vld [vmem:[%s1480_s18 + $0x30] sm:$0xf0] }
  0x1b   : > { %511 = vmatpush.bf16.msra.mxu3 %v1252_v33  ;;  %v1260_v1 = vor.u32 %v1373_v63, %v1257_v0 }
  0x1d   : > { %217 = vxpose.xlu0.c.b16.end [2/2] (short) %v1236_v34, 128  ;;  %559 = vmatpush.bf16.msrb.mxu0 %v346_v49 }
  0x1e   : > { %657 = vmatpush.bf16.msrb.mxu2 %v352_v46  ;;  %608 = vmatpush.bf16.msrb.mxu1 %v349_v50 }
  0x1f   : > { %706 = vmatpush.bf16.msrb.mxu3 %v355_v48 }
  0x21   : > { %560 = vmatpush.bf16.msrb.mxu0 %v1256_v62 }
  0x22   : > { %658 = vmatpush.bf16.msrb.mxu2 %v1264_v57  ;;  %609 = vmatpush.bf16.msrb.mxu1 %v1260_v1 }
  0x23   : > { %707 = vmatpush.bf16.msrb.mxu3 %v1268_v61 }
  0xb9   : > { %v1512_v51 = vpop.trf.xlu0 }
  0xba   : > { %1301 = vmatmul.msk.bf16.vlgmr.msra.gmra.mxu0 %vm304_vm2, %v1512_v51  ;;  %1309 = vmatmul.msk.bf16.vlgmr.msra.gmra.mxu1 %vm304_vm2, %v1512_v51 }
  0xbb   : > { %1317 = vmatmul.msk.bf16.vlgmr.msra.gmra.mxu2 %vm304_vm2, %v1512_v51  ;;  %1325 = vmatmul.msk.bf16.vlgmr.msra.gmra.mxu3 %vm304_vm2, %v1512_v51 }
  0xc9   : > { %v1522_v52 = vpop.trf.xlu0 }
  0xca   : > { %1302 = vmatmul.msk.bf16.gmra.mxu0 %vm304_vm2, %v1522_v52  ;;  %1310 = vmatmul.msk.bf16.gmra.mxu1 %vm304_vm2, %v1522_v52 }
  0xcb   : > { %1318 = vmatmul.msk.bf16.gmra.mxu2 %vm304_vm2, %v1522_v52  ;;  %1326 = vmatmul.msk.bf16.gmra.mxu3 %vm304_vm2, %v1522_v52 }
  0xd9   : > { %v1532_v53 = vpop.trf.xlu0 }
  0xda   : > { %1303 = vmatmul.msk.bf16.gmra.mxu0 %vm304_vm2, %v1532_v53  ;;  %1311 = vmatmul.msk.bf16.gmra.mxu1 %vm304_vm2, %v1532_v53 }
  0xdb   : > { %1319 = vmatmul.msk.bf16.gmra.mxu2 %vm304_vm2, %v1532_v53  ;;  %1327 = vmatmul.msk.bf16.gmra.mxu3 %vm304_vm2, %v1532_v53 }
  0xe9   : > { %v1550_v2 = vpop.trf.xlu0 }
  0xea   : > { %1304 = vmatmul.msk.bf16.gmra.mxu0 %vm304_vm2, %v1550_v2  ;;  %1312 = vmatmul.msk.bf16.gmra.mxu1 %vm304_vm2, %v1550_v2 }
  0xeb   : > { %1320 = vmatmul.msk.bf16.gmra.mxu2 %vm304_vm2, %v1550_v2  ;;  %1328 = vmatmul.msk.bf16.gmra.mxu3 %vm304_vm2, %v1550_v2 }
  0xf9   : > { %v1560_v3 = vpop.trf.xlu0 }
  0xfa   : > { %1305 = vmatmul.msk.bf16.gmra.mxu0 %vm304_vm2, %v1560_v3  ;;  %1313 = vmatmul.msk.bf16.gmra.mxu1 %vm304_vm2, %v1560_v3 }
  0xfb   : > { %1321 = vmatmul.msk.bf16.gmra.mxu2 %vm304_vm2, %v1560_v3  ;;  %1329 = vmatmul.msk.bf16.gmra.mxu3 %vm304_vm2, %v1560_v3 }
 0x109   : > { %v1570_v4 = vpop.trf.xlu0 }
 0x10a   : > { %1306 = vmatmul.msk.bf16.gmra.mxu0 %vm304_vm2, %v1570_v4  ;;  %1314 = vmatmul.msk.bf16.gmra.mxu1 %vm304_vm2, %v1570_v4 }
 0x10b   : > { %1322 = vmatmul.msk.bf16.gmra.mxu2 %vm304_vm2, %v1570_v4  ;;  %1330 = vmatmul.msk.bf16.gmra.mxu3 %vm304_vm2, %v1570_v4 }
 0x119   : > { %v1580_v5 = vpop.trf.xlu0 }
 0x11a   : > { %1307 = vmatmul.msk.bf16.gmra.mxu0 %vm304_vm2, %v1580_v5  ;;  %1315 = vmatmul.msk.bf16.gmra.mxu1 %vm304_vm2, %v1580_v5 }
 0x11b   : > { %1323 = vmatmul.msk.bf16.gmra.mxu2 %vm304_vm2, %v1580_v5  ;;  %1331 = vmatmul.msk.bf16.gmra.mxu3 %vm304_vm2, %v1580_v5 }
 0x129   : > { %v1590_v6 = vpop.trf.xlu0 }
 0x12a   : > { %1308 = vmatmul.msk.bf16.gmra.mxu0 %vm304_vm2, %v1590_v6  ;;  %1316 = vmatmul.msk.bf16.gmra.mxu1 %vm304_vm2, %v1590_v6 }
 0x12b   : > { %1324 = vmatmul.msk.bf16.gmra.mxu2 %vm304_vm2, %v1590_v6  ;;  %1332 = vmatmul.msk.bf16.gmra.mxu3 %vm304_vm2, %v1590_v6 }
 0x137   : > { %v366_v7 = vpop.f32.mrf.mxu0  ;;  %v415_v8 = vpop.f32.mrf.mxu1 }
 0x138   : > { %v749_v9 = vmul.f32 0.2, %v366_v7  ;;  %v750_v10 = vmul.f32 0.2, %v415_v8 }
 0x13a   : > { %v877_v11 = vmax.f32 %v366_v7, %v749_v9  ;;  %v878_v12 = vmax.f32 %v415_v8, %v750_v10  ;;  %1333 = vmatmul.msk.bf16.vlgmr.msrb.gmra.mxu0 %vm304_vm2, %v1512_v51  ;;  %1341 = vmatmul.msk.bf16.vlgmr.msrb.gmra.mxu1 %vm304_vm2, %v1512_v51 }
 0x13b   : > { %1349 = vmatmul.msk.bf16.vlgmr.msrb.gmra.mxu2 %vm304_vm2, %v1512_v51  ;;  %1357 = vmatmul.msk.bf16.vlgmr.msrb.gmra.mxu3 %vm304_vm2, %v1512_v51 }
 0x13c   : > { %v1005_v13 = vpack.c.bf16 %v878_v12, %v877_v11 }
 0x13e   : > { %1069 = vst [vmem:[%s1608_s26] sm:$0xff] %v1005_v13  ;;  %v464_v14 = vpop.f32.mrf.mxu2  ;;  %v513_v15 = vpop.f32.mrf.mxu3 }
 0x13f   : > { %v751_v16 = vmul.f32 0.2, %v464_v14  ;;  %v752_v17 = vmul.f32 0.2, %v513_v15  ;;  %v368_v18 = vpop.f32.mrf.mxu0  ;;  %v417_v19 = vpop.f32.mrf.mxu1 }
 0x140   : > { %v757_v20 = vmul.f32 0.2, %v368_v18  ;;  %v758_v21 = vmul.f32 0.2, %v417_v19 }
 0x141   : > { %v879_v22 = vmax.f32 %v464_v14, %v751_v16  ;;  %v880_v23 = vmax.f32 %v513_v15, %v752_v17 }
 0x142   : > { %v885_v24 = vmax.f32 %v368_v18, %v757_v20  ;;  %v886_v25 = vmax.f32 %v417_v19, %v758_v21 }
 0x143   : > { %v1006_v26 = vpack.c.bf16 %v880_v23, %v879_v22 }
 0x144   : > { %v1009_v27 = vpack.c.bf16 %v886_v25, %v885_v24 }
 0x145   : > { %1070 = vst [vmem:[%s1608_s26 + $0x8] sm:$0xff] %v1006_v26 }
 0x146   : > { %1073 = vst [vmem:[%s1608_s26 + $0x20] sm:$0xff] %v1009_v27  ;;  %v466_v28 = vpop.f32.mrf.mxu2  ;;  %v515_v29 = vpop.f32.mrf.mxu3 }
 0x147   : > { %v759_v30 = vmul.f32 0.2, %v466_v28  ;;  %v760_v31 = vmul.f32 0.2, %v515_v29  ;;  %v371_v32 = vpop.f32.mrf.mxu0  ;;  %v420_v33 = vpop.f32.mrf.mxu1 }
 0x148   : > { %v765_v34 = vmul.f32 0.2, %v371_v32  ;;  %v766_v35 = vmul.f32 0.2, %v420_v33 }
 0x149   : > { %v887_v36 = vmax.f32 %v466_v28, %v759_v30  ;;  %v888_v37 = vmax.f32 %v515_v29, %v760_v31 }
 0x14a   : > { %v893_v38 = vmax.f32 %v371_v32, %v765_v34  ;;  %v894_v39 = vmax.f32 %v420_v33, %v766_v35  ;;  %1334 = vmatmul.msk.bf16.gmra.mxu0 %vm304_vm2, %v1522_v52  ;;  %1342 = vmatmul.msk.bf16.gmra.mxu1 %vm304_vm2, %v1522_v52 }
 0x14b   : > { %v1010_v40 = vpack.c.bf16 %v888_v37, %v887_v36  ;;  %1350 = vmatmul.msk.bf16.gmra.mxu2 %vm304_vm2, %v1522_v52  ;;  %1358 = vmatmul.msk.bf16.gmra.mxu3 %vm304_vm2, %v1522_v52 }
 0x14c   : > { %v1013_v41 = vpack.c.bf16 %v894_v39, %v893_v38 }
 0x14d   : > { %1074 = vst [vmem:[%s1608_s26 + $0x28] sm:$0xff] %v1010_v40 }
 0x14e   : > { %1077 = vst [vmem:[%s1608_s26 + $0x40] sm:$0xff] %v1013_v41  ;;  %v469_v42 = vpop.f32.mrf.mxu2  ;;  %v518_v43 = vpop.f32.mrf.mxu3 }
 0x14f   : > { %v767_v44 = vmul.f32 0.2, %v469_v42  ;;  %v768_v45 = vmul.f32 0.2, %v518_v43  ;;  %v373_v46 = vpop.f32.mrf.mxu0  ;;  %v422_v47 = vpop.f32.mrf.mxu1 }
 0x150   : > { %v773_v48 = vmul.f32 0.2, %v373_v46  ;;  %v774_v49 = vmul.f32 0.2, %v422_v47 }
 0x151   : > { %v895_v50 = vmax.f32 %v469_v42, %v767_v44  ;;  %v896_v51 = vmax.f32 %v518_v43, %v768_v45 }
 0x152   : > { %v901_v54 = vmax.f32 %v373_v46, %v773_v48  ;;  %v902_v55 = vmax.f32 %v422_v47, %v774_v49 }
 0x153   : > { %v1014_v56 = vpack.c.bf16 %v896_v51, %v895_v50 }
 0x154   : > { %v1017_v57 = vpack.c.bf16 %v902_v55, %v901_v54 }
 0x155   : > { %1078 = vst [vmem:[%s1608_s26 + $0x48] sm:$0xff] %v1014_v56 }
 0x156   : > { %1081 = vst [vmem:[%s1608_s26 + $0x60] sm:$0xff] %v1017_v57  ;;  %v471_v52 = vpop.f32.mrf.mxu2  ;;  %v520_v58 = vpop.f32.mrf.mxu3 }
 0x157   : > { %v775_v59 = vmul.f32 0.2, %v471_v52  ;;  %v776_v60 = vmul.f32 0.2, %v520_v58  ;;  %v376_v61 = vpop.f32.mrf.mxu0  ;;  %v425_v62 = vpop.f32.mrf.mxu1 }
 0x158   : > { %v781_v63 = vmul.f32 0.2, %v376_v61  ;;  %v782_v0 = vmul.f32 0.2, %v425_v62 }
 0x159   : > { %v903_v1 = vmax.f32 %v471_v52, %v775_v59  ;;  %v904_v7 = vmax.f32 %v520_v58, %v776_v60 }
 0x15a   : > { %v909_v8 = vmax.f32 %v376_v61, %v781_v63  ;;  %v910_v9 = vmax.f32 %v425_v62, %v782_v0  ;;  %1335 = vmatmul.msk.bf16.gmra.mxu0 %vm304_vm2, %v1532_v53  ;;  %1343 = vmatmul.msk.bf16.gmra.mxu1 %vm304_vm2, %v1532_v53 }
 0x15b   : > { %v1018_v10 = vpack.c.bf16 %v904_v7, %v903_v1  ;;  %1351 = vmatmul.msk.bf16.gmra.mxu2 %vm304_vm2, %v1532_v53  ;;  %1359 = vmatmul.msk.bf16.gmra.mxu3 %vm304_vm2, %v1532_v53 }
 0x15c   : > { %v1021_v11 = vpack.c.bf16 %v910_v9, %v909_v8 }
 0x15d   : > { %1082 = vst [vmem:[%s1608_s26 + $0x68] sm:$0xff] %v1018_v10 }
 0x15e   : > { %1085 = vst [vmem:[%s1608_s26 + $0x80] sm:$0xff] %v1021_v11  ;;  %v474_v12 = vpop.f32.mrf.mxu2  ;;  %v523_v13 = vpop.f32.mrf.mxu3 }
 0x15f   : > { %v783_v14 = vmul.f32 0.2, %v474_v12  ;;  %v784_v15 = vmul.f32 0.2, %v523_v13  ;;  %v378_v16 = vpop.f32.mrf.mxu0  ;;  %v427_v17 = vpop.f32.mrf.mxu1 }
 0x160   : > { %v789_v18 = vmul.f32 0.2, %v378_v16  ;;  %v790_v19 = vmul.f32 0.2, %v427_v17 }
 0x161   : > { %v911_v20 = vmax.f32 %v474_v12, %v783_v14  ;;  %v912_v21 = vmax.f32 %v523_v13, %v784_v15 }
 0x162   : > { %v917_v22 = vmax.f32 %v378_v16, %v789_v18  ;;  %v918_v23 = vmax.f32 %v427_v17, %v790_v19 }
 0x163   : > { %v1022_v24 = vpack.c.bf16 %v912_v21, %v911_v20 }
 0x164   : > { %v1025_v25 = vpack.c.bf16 %v918_v23, %v917_v22 }
 0x165   : > { %1086 = vst [vmem:[%s1608_s26 + $0x88] sm:$0xff] %v1022_v24 }
 0x166   : > { %1089 = vst [vmem:[%s1608_s26 + $0xa0] sm:$0xff] %v1025_v25  ;;  %v476_v53 = vpop.f32.mrf.mxu2  ;;  %v525_v26 = vpop.f32.mrf.mxu3 }
 0x167   : > { %v791_v27 = vmul.f32 0.2, %v476_v53  ;;  %v792_v28 = vmul.f32 0.2, %v525_v26  ;;  %v381_v29 = vpop.f32.mrf.mxu0  ;;  %v430_v30 = vpop.f32.mrf.mxu1 }
 0x168   : > { %v797_v31 = vmul.f32 0.2, %v381_v29  ;;  %v798_v32 = vmul.f32 0.2, %v430_v30 }
 0x169   : > { %v919_v33 = vmax.f32 %v476_v53, %v791_v27  ;;  %v920_v34 = vmax.f32 %v525_v26, %v792_v28 }
 0x16a   : > { %v925_v35 = vmax.f32 %v381_v29, %v797_v31  ;;  %v926_v36 = vmax.f32 %v430_v30, %v798_v32  ;;  %1336 = vmatmul.msk.bf16.gmra.mxu0 %vm304_vm2, %v1550_v2  ;;  %1344 = vmatmul.msk.bf16.gmra.mxu1 %vm304_vm2, %v1550_v2 }
 0x16b   : > { %v1026_v37 = vpack.c.bf16 %v920_v34, %v919_v33  ;;  %1352 = vmatmul.msk.bf16.gmra.mxu2 %vm304_vm2, %v1550_v2  ;;  %1360 = vmatmul.msk.bf16.gmra.mxu3 %vm304_vm2, %v1550_v2 }
 0x16c   : > { %v1029_v38 = vpack.c.bf16 %v926_v36, %v925_v35 }
 0x16d   : > { %1090 = vst [vmem:[%s1608_s26 + $0xa8] sm:$0xff] %v1026_v37 }
 0x16e   : > { %1093 = vst [vmem:[%s1608_s26 + $0xc0] sm:$0xff] %v1029_v38  ;;  %v479_v39 = vpop.f32.mrf.mxu2  ;;  %v528_v40 = vpop.f32.mrf.mxu3 }
 0x16f   : > { %v799_v41 = vmul.f32 0.2, %v479_v39  ;;  %v800_v42 = vmul.f32 0.2, %v528_v40  ;;  %v383_v43 = vpop.f32.mrf.mxu0  ;;  %v432_v44 = vpop.f32.mrf.mxu1 }
 0x170   : > { %v805_v45 = vmul.f32 0.2, %v383_v43  ;;  %v806_v46 = vmul.f32 0.2, %v432_v44 }
 0x171   : > { %v927_v47 = vmax.f32 %v479_v39, %v799_v41  ;;  %v928_v48 = vmax.f32 %v528_v40, %v800_v42 }
 0x172   : > { %v933_v49 = vmax.f32 %v383_v43, %v805_v45  ;;  %v934_v50 = vmax.f32 %v432_v44, %v806_v46 }
 0x173   : > { %v1030_v51 = vpack.c.bf16 %v928_v48, %v927_v47 }
 0x174   : > { %v1033_v54 = vpack.c.bf16 %v934_v50, %v933_v49 }
 0x175   : > { %1094 = vst [vmem:[%s1608_s26 + $0xc8] sm:$0xff] %v1030_v51 }
 0x176   : > { %1097 = vst [vmem:[%s1608_s26 + $0xe0] sm:$0xff] %v1033_v54  ;;  %v481_v2 = vpop.f32.mrf.mxu2  ;;  %v530_v55 = vpop.f32.mrf.mxu3 }
 0x177   : > { %v807_v56 = vmul.f32 0.2, %v481_v2  ;;  %v808_v57 = vmul.f32 0.2, %v530_v55  ;;  %v386_v52 = vpop.f32.mrf.mxu0  ;;  %v435_v58 = vpop.f32.mrf.mxu1 }
 0x178   : > { %v813_v59 = vmul.f32 0.2, %v386_v52  ;;  %v814_v60 = vmul.f32 0.2, %v435_v58 }
 0x179   : > { %v935_v61 = vmax.f32 %v481_v2, %v807_v56  ;;  %v936_v62 = vmax.f32 %v530_v55, %v808_v57 }
 0x17a   : > { %v941_v63 = vmax.f32 %v386_v52, %v813_v59  ;;  %v942_v0 = vmax.f32 %v435_v58, %v814_v60  ;;  %1337 = vmatmul.msk.bf16.gmra.mxu0 %vm304_vm2, %v1560_v3  ;;  %1345 = vmatmul.msk.bf16.gmra.mxu1 %vm304_vm2, %v1560_v3 }
 0x17b   : > { %v1034_v1 = vpack.c.bf16 %v936_v62, %v935_v61  ;;  %1353 = vmatmul.msk.bf16.gmra.mxu2 %vm304_vm2, %v1560_v3  ;;  %1361 = vmatmul.msk.bf16.gmra.mxu3 %vm304_vm2, %v1560_v3 }
 0x17c   : > { %v1037_v7 = vpack.c.bf16 %v942_v0, %v941_v63 }
 0x17d   : > { %1098 = vst [vmem:[%s1608_s26 + $0xe8] sm:$0xff] %v1034_v1 }
 0x17e   : > { %1101 = vst [vmem:[%s1608_s26 + $0x100] sm:$0xff] %v1037_v7  ;;  %v484_v8 = vpop.f32.mrf.mxu2  ;;  %v533_v9 = vpop.f32.mrf.mxu3 }
 0x17f   : > { %v815_v10 = vmul.f32 0.2, %v484_v8  ;;  %v816_v11 = vmul.f32 0.2, %v533_v9  ;;  %v388_v12 = vpop.f32.mrf.mxu0  ;;  %v437_v13 = vpop.f32.mrf.mxu1 }
 0x180   : > { %v821_v14 = vmul.f32 0.2, %v388_v12  ;;  %v822_v15 = vmul.f32 0.2, %v437_v13 }
 0x181   : > { %v943_v16 = vmax.f32 %v484_v8, %v815_v10  ;;  %v944_v17 = vmax.f32 %v533_v9, %v816_v11 }
 0x182   : > { %v949_v18 = vmax.f32 %v388_v12, %v821_v14  ;;  %v950_v19 = vmax.f32 %v437_v13, %v822_v15 }
 0x183   : > { %v1038_v20 = vpack.c.bf16 %v944_v17, %v943_v16 }
 0x184   : > { %v1041_v21 = vpack.c.bf16 %v950_v19, %v949_v18 }
 0x185   : > { %1102 = vst [vmem:[%s1608_s26 + $0x108] sm:$0xff] %v1038_v20 }
 0x186   : > { %1105 = vst [vmem:[%s1608_s26 + $0x120] sm:$0xff] %v1041_v21  ;;  %v486_v3 = vpop.f32.mrf.mxu2  ;;  %v535_v22 = vpop.f32.mrf.mxu3 }
 0x187   : > { %v823_v23 = vmul.f32 0.2, %v486_v3  ;;  %v824_v24 = vmul.f32 0.2, %v535_v22  ;;  %v391_v25 = vpop.f32.mrf.mxu0  ;;  %v440_v53 = vpop.f32.mrf.mxu1 }
 0x188   : > { %v829_v26 = vmul.f32 0.2, %v391_v25  ;;  %v830_v27 = vmul.f32 0.2, %v440_v53 }
 0x189   : > { %v951_v28 = vmax.f32 %v486_v3, %v823_v23  ;;  %v952_v29 = vmax.f32 %v535_v22, %v824_v24 }
 0x18a   : > { %v957_v30 = vmax.f32 %v391_v25, %v829_v26  ;;  %v958_v31 = vmax.f32 %v440_v53, %v830_v27  ;;  %1338 = vmatmul.msk.bf16.gmra.mxu0 %vm304_vm2, %v1570_v4  ;;  %1346 = vmatmul.msk.bf16.gmra.mxu1 %vm304_vm2, %v1570_v4 }
 0x18b   : > { %v1042_v32 = vpack.c.bf16 %v952_v29, %v951_v28  ;;  %1354 = vmatmul.msk.bf16.gmra.mxu2 %vm304_vm2, %v1570_v4  ;;  %1362 = vmatmul.msk.bf16.gmra.mxu3 %vm304_vm2, %v1570_v4 }
 0x18c   : > { %v1045_v33 = vpack.c.bf16 %v958_v31, %v957_v30 }
 0x18d   : > { %1106 = vst [vmem:[%s1608_s26 + $0x128] sm:$0xff] %v1042_v32 }
 0x18e   : > { %1109 = vst [vmem:[%s1608_s26 + $0x140] sm:$0xff] %v1045_v33  ;;  %v489_v34 = vpop.f32.mrf.mxu2  ;;  %v538_v35 = vpop.f32.mrf.mxu3 }
 0x18f   : > { %v831_v36 = vmul.f32 0.2, %v489_v34  ;;  %v832_v37 = vmul.f32 0.2, %v538_v35  ;;  %v393_v38 = vpop.f32.mrf.mxu0  ;;  %v442_v39 = vpop.f32.mrf.mxu1 }
 0x190   : > { %v837_v40 = vmul.f32 0.2, %v393_v38  ;;  %v838_v41 = vmul.f32 0.2, %v442_v39 }
 0x191   : > { %v959_v42 = vmax.f32 %v489_v34, %v831_v36  ;;  %v960_v43 = vmax.f32 %v538_v35, %v832_v37 }
 0x192   : > { %v965_v44 = vmax.f32 %v393_v38, %v837_v40  ;;  %v966_v45 = vmax.f32 %v442_v39, %v838_v41 }
 0x193   : > { %v1046_v46 = vpack.c.bf16 %v960_v43, %v959_v42 }
 0x194   : > { %v1049_v47 = vpack.c.bf16 %v966_v45, %v965_v44 }
 0x195   : > { %1110 = vst [vmem:[%s1608_s26 + $0x148] sm:$0xff] %v1046_v46 }
 0x196   : > { %1113 = vst [vmem:[%s1608_s26 + $0x160] sm:$0xff] %v1049_v47  ;;  %v491_v4 = vpop.f32.mrf.mxu2  ;;  %v540_v48 = vpop.f32.mrf.mxu3 }
 0x197   : > { %v839_v49 = vmul.f32 0.2, %v491_v4  ;;  %v840_v50 = vmul.f32 0.2, %v540_v48  ;;  %v396_v51 = vpop.f32.mrf.mxu0  ;;  %v445_v54 = vpop.f32.mrf.mxu1 }
 0x198   : > { %v845_v2 = vmul.f32 0.2, %v396_v51  ;;  %v846_v55 = vmul.f32 0.2, %v445_v54 }
 0x199   : > { %v967_v56 = vmax.f32 %v491_v4, %v839_v49  ;;  %v968_v57 = vmax.f32 %v540_v48, %v840_v50 }
 0x19a   : > { %v973_v52 = vmax.f32 %v396_v51, %v845_v2  ;;  %v974_v58 = vmax.f32 %v445_v54, %v846_v55  ;;  %1339 = vmatmul.msk.bf16.gmra.mxu0 %vm304_vm2, %v1580_v5  ;;  %1347 = vmatmul.msk.bf16.gmra.mxu1 %vm304_vm2, %v1580_v5 }
 0x19b   : > { %v1050_v59 = vpack.c.bf16 %v968_v57, %v967_v56  ;;  %1355 = vmatmul.msk.bf16.gmra.mxu2 %vm304_vm2, %v1580_v5  ;;  %1363 = vmatmul.msk.bf16.gmra.mxu3 %vm304_vm2, %v1580_v5 }
 0x19c   : > { %v1053_v60 = vpack.c.bf16 %v974_v58, %v973_v52 }
 0x19d   : > { %1114 = vst [vmem:[%s1608_s26 + $0x168] sm:$0xff] %v1050_v59 }
 0x19e   : > { %1117 = vst [vmem:[%s1608_s26 + $0x180] sm:$0xff] %v1053_v60  ;;  %v494_v61 = vpop.f32.mrf.mxu2  ;;  %v543_v62 = vpop.f32.mrf.mxu3 }
 0x19f   : > { %v847_v63 = vmul.f32 0.2, %v494_v61  ;;  %v848_v0 = vmul.f32 0.2, %v543_v62  ;;  %v398_v1 = vpop.f32.mrf.mxu0  ;;  %v447_v7 = vpop.f32.mrf.mxu1 }
 0x1a0   : > { %v853_v8 = vmul.f32 0.2, %v398_v1  ;;  %v854_v9 = vmul.f32 0.2, %v447_v7 }
 0x1a1   : > { %v975_v10 = vmax.f32 %v494_v61, %v847_v63  ;;  %v976_v11 = vmax.f32 %v543_v62, %v848_v0 }
 0x1a2   : > { %v981_v12 = vmax.f32 %v398_v1, %v853_v8  ;;  %v982_v13 = vmax.f32 %v447_v7, %v854_v9 }
 0x1a3   : > { %v1054_v14 = vpack.c.bf16 %v976_v11, %v975_v10 }
 0x1a4   : > { %v1057_v15 = vpack.c.bf16 %v982_v13, %v981_v12 }
 0x1a5   : > { %1118 = vst [vmem:[%s1608_s26 + $0x188] sm:$0xff] %v1054_v14 }
 0x1a6   : > { %1121 = vst [vmem:[%s1608_s26 + $0x1a0] sm:$0xff] %v1057_v15  ;;  %v496_v5 = vpop.f32.mrf.mxu2  ;;  %v545_v16 = vpop.f32.mrf.mxu3 }
 0x1a7   : > { %v855_v17 = vmul.f32 0.2, %v496_v5  ;;  %v856_v18 = vmul.f32 0.2, %v545_v16  ;;  %v401_v19 = vpop.f32.mrf.mxu0  ;;  %v450_v20 = vpop.f32.mrf.mxu1 }
 0x1a8   : > { %v861_v21 = vmul.f32 0.2, %v401_v19  ;;  %v862_v3 = vmul.f32 0.2, %v450_v20 }
 0x1a9   : > { %v983_v22 = vmax.f32 %v496_v5, %v855_v17  ;;  %v984_v23 = vmax.f32 %v545_v16, %v856_v18 }
 0x1aa   : > { %v989_v24 = vmax.f32 %v401_v19, %v861_v21  ;;  %v990_v25 = vmax.f32 %v450_v20, %v862_v3  ;;  %1340 = vmatmul.msk.bf16.gmra.mxu0 %vm304_vm2, %v1590_v6  ;;  %1348 = vmatmul.msk.bf16.gmra.mxu1 %vm304_vm2, %v1590_v6 }
 0x1ab   : > { %v1058_v53 = vpack.c.bf16 %v984_v23, %v983_v22  ;;  %1356 = vmatmul.msk.bf16.gmra.mxu2 %vm304_vm2, %v1590_v6  ;;  %1364 = vmatmul.msk.bf16.gmra.mxu3 %vm304_vm2, %v1590_v6 }
 0x1ac   : > { %v1061_v26 = vpack.c.bf16 %v990_v25, %v989_v24 }
 0x1ad   : > { %1122 = vst [vmem:[%s1608_s26 + $0x1a8] sm:$0xff] %v1058_v53 }
 0x1ae   : > { %1125 = vst [vmem:[%s1608_s26 + $0x1c0] sm:$0xff] %v1061_v26  ;;  %v499_v27 = vpop.f32.mrf.mxu2  ;;  %v548_v28 = vpop.f32.mrf.mxu3 }
 0x1af   : > { %v863_v29 = vmul.f32 0.2, %v499_v27  ;;  %v864_v30 = vmul.f32 0.2, %v548_v28  ;;  %v403_v31 = vpop.f32.mrf.mxu0  ;;  %v452_v32 = vpop.f32.mrf.mxu1 }
 0x1b0   : > { %v869_v33 = vmul.f32 0.2, %v403_v31  ;;  %v870_v34 = vmul.f32 0.2, %v452_v32 }
 0x1b1   : > { %v991_v35 = vmax.f32 %v499_v27, %v863_v29  ;;  %v992_v36 = vmax.f32 %v548_v28, %v864_v30 }
 0x1b2   : > { %v997_v37 = vmax.f32 %v403_v31, %v869_v33  ;;  %v998_v38 = vmax.f32 %v452_v32, %v870_v34 }
 0x1b3   : > { %v1062_v39 = vpack.c.bf16 %v992_v36, %v991_v35 }
 0x1b4   : > { %v1065_v40 = vpack.c.bf16 %v998_v38, %v997_v37 }
 0x1b5   : > { %1126 = vst [vmem:[%s1608_s26 + $0x1c8] sm:$0xff] %v1062_v39 }
 0x1b6   : > { %1129 = vst [vmem:[%s1608_s26 + $0x1e0] sm:$0xff] %v1065_v40  ;;  %v501_v6 = vpop.f32.mrf.mxu2  ;;  %v550_v41 = vpop.f32.mrf.mxu3 }
 0x1b7   : > { %v871_v42 = vmul.f32 0.2, %v501_v6  ;;  %v872_v43 = vmul.f32 0.2, %v550_v41  ;;  %v562_v44 = vpop.f32.mrf.mxu0  ;;  %v611_v45 = vpop.f32.mrf.mxu1 }
 0x1b8   : > { %v753_v46 = vmul.f32 0.2, %v562_v44  ;;  %v754_v47 = vmul.f32 0.2, %v611_v45 }
 0x1b9   : > { %v999_v4 = vmax.f32 %v501_v6, %v871_v42  ;;  %v1000_v48 = vmax.f32 %v550_v41, %v872_v43 }
 0x1ba   : > { %v881_v49 = vmax.f32 %v562_v44, %v753_v46  ;;  %v882_v50 = vmax.f32 %v611_v45, %v754_v47 }
 0x1bb   : > { %v1066_v51 = vpack.c.bf16 %v1000_v48, %v999_v4 }
 0x1bc   : > { %v1007_v54 = vpack.c.bf16 %v882_v50, %v881_v49 }
 0x1bd   : > { %1130 = vst [vmem:[%s1608_s26 + $0x1e8] sm:$0xff] %v1066_v51 }
 0x1be   : > { %1071 = vst [vmem:[%s1608_s26 + $0x10] sm:$0xff] %v1007_v54  ;;  %v660_v2 = vpop.f32.mrf.mxu2  ;;  %v709_v55 = vpop.f32.mrf.mxu3 }
 0x1bf   : > { %v755_v56 = vmul.f32 0.2, %v660_v2  ;;  %v756_v57 = vmul.f32 0.2, %v709_v55  ;;  %v564_v52 = vpop.f32.mrf.mxu0  ;;  %v613_v58 = vpop.f32.mrf.mxu1 }
 0x1c0   : > { %v761_v59 = vmul.f32 0.2, %v564_v52  ;;  %v762_v60 = vmul.f32 0.2, %v613_v58 }
 0x1c1   : > { %v883_v61 = vmax.f32 %v660_v2, %v755_v56  ;;  %v884_v62 = vmax.f32 %v709_v55, %v756_v57 }
 0x1c2   : > { %v889_v63 = vmax.f32 %v564_v52, %v761_v59  ;;  %v890_v0 = vmax.f32 %v613_v58, %v762_v60 }
 0x1c3   : > { %v1008_v1 = vpack.c.bf16 %v884_v62, %v883_v61 }
 0x1c4   : > { %v1011_v7 = vpack.c.bf16 %v890_v0, %v889_v63 }
 0x1c5   : > { %1072 = vst [vmem:[%s1608_s26 + $0x18] sm:$0xff] %v1008_v1 }
 0x1c6   : > { %1075 = vst [vmem:[%s1608_s26 + $0x30] sm:$0xff] %v1011_v7  ;;  %v662_v8 = vpop.f32.mrf.mxu2  ;;  %v711_v9 = vpop.f32.mrf.mxu3 }
 0x1c7   : > { %v763_v10 = vmul.f32 0.2, %v662_v8  ;;  %v764_v11 = vmul.f32 0.2, %v711_v9  ;;  %v567_v12 = vpop.f32.mrf.mxu0  ;;  %v616_v13 = vpop.f32.mrf.mxu1 }
 0x1c8   : > { %v769_v14 = vmul.f32 0.2, %v567_v12  ;;  %v770_v15 = vmul.f32 0.2, %v616_v13 }
 0x1c9   : > { %v891_v5 = vmax.f32 %v662_v8, %v763_v10  ;;  %v892_v16 = vmax.f32 %v711_v9, %v764_v11 }
 0x1ca   : > { %v897_v17 = vmax.f32 %v567_v12, %v769_v14  ;;  %v898_v18 = vmax.f32 %v616_v13, %v770_v15 }
 0x1cb   : > { %v1012_v19 = vpack.c.bf16 %v892_v16, %v891_v5 }
 0x1cc   : > { %v1015_v20 = vpack.c.bf16 %v898_v18, %v897_v17 }
 0x1cd   : > { %1076 = vst [vmem:[%s1608_s26 + $0x38] sm:$0xff] %v1012_v19 }
 0x1ce   : > { %1079 = vst [vmem:[%s1608_s26 + $0x50] sm:$0xff] %v1015_v20  ;;  %v665_v21 = vpop.f32.mrf.mxu2  ;;  %v714_v3 = vpop.f32.mrf.mxu3 }
 0x1cf   : > { %v771_v22 = vmul.f32 0.2, %v665_v21  ;;  %v772_v23 = vmul.f32 0.2, %v714_v3  ;;  %v569_v24 = vpop.f32.mrf.mxu0  ;;  %v618_v25 = vpop.f32.mrf.mxu1 }
 0x1d0   : > { %v777_v53 = vmul.f32 0.2, %v569_v24  ;;  %v778_v26 = vmul.f32 0.2, %v618_v25 }
 0x1d1   : > { %v899_v27 = vmax.f32 %v665_v21, %v771_v22  ;;  %v900_v28 = vmax.f32 %v714_v3, %v772_v23 }
 0x1d2   : > { %v905_v29 = vmax.f32 %v569_v24, %v777_v53  ;;  %v906_v30 = vmax.f32 %v618_v25, %v778_v26 }
 0x1d3   : > { %v1016_v31 = vpack.c.bf16 %v900_v28, %v899_v27 }
 0x1d4   : > { %v1019_v32 = vpack.c.bf16 %v906_v30, %v905_v29 }
 0x1d5   : > { %1080 = vst [vmem:[%s1608_s26 + $0x58] sm:$0xff] %v1016_v31 }
 0x1d6   : > { %1083 = vst [vmem:[%s1608_s26 + $0x70] sm:$0xff] %v1019_v32  ;;  %v667_v33 = vpop.f32.mrf.mxu2  ;;  %v716_v34 = vpop.f32.mrf.mxu3 }
 0x1d7   : > { %v779_v35 = vmul.f32 0.2, %v667_v33  ;;  %v780_v36 = vmul.f32 0.2, %v716_v34  ;;  %v572_v37 = vpop.f32.mrf.mxu0  ;;  %v621_v38 = vpop.f32.mrf.mxu1 }
 0x1d8   : > { %v785_v39 = vmul.f32 0.2, %v572_v37  ;;  %v786_v40 = vmul.f32 0.2, %v621_v38 }
 0x1d9   : > { %v907_v6 = vmax.f32 %v667_v33, %v779_v35  ;;  %v908_v41 = vmax.f32 %v716_v34, %v780_v36 }
 0x1da   : > { %v913_v42 = vmax.f32 %v572_v37, %v785_v39  ;;  %v914_v43 = vmax.f32 %v621_v38, %v786_v40 }
 0x1db   : > { %v1020_v44 = vpack.c.bf16 %v908_v41, %v907_v6 }
 0x1dc   : > { %v1023_v45 = vpack.c.bf16 %v914_v43, %v913_v42 }
 0x1dd   : > { %1084 = vst [vmem:[%s1608_s26 + $0x78] sm:$0xff] %v1020_v44 }
 0x1de   : > { %1087 = vst [vmem:[%s1608_s26 + $0x90] sm:$0xff] %v1023_v45  ;;  %v670_v46 = vpop.f32.mrf.mxu2  ;;  %v719_v47 = vpop.f32.mrf.mxu3 }
 0x1df   : > { %v787_v4 = vmul.f32 0.2, %v670_v46  ;;  %v788_v48 = vmul.f32 0.2, %v719_v47  ;;  %v574_v49 = vpop.f32.mrf.mxu0  ;;  %v623_v50 = vpop.f32.mrf.mxu1 }
 0x1e0   : > { %v793_v51 = vmul.f32 0.2, %v574_v49  ;;  %v794_v54 = vmul.f32 0.2, %v623_v50 }
 0x1e1   : > { %v915_v2 = vmax.f32 %v670_v46, %v787_v4  ;;  %v916_v55 = vmax.f32 %v719_v47, %v788_v48 }
 0x1e2   : > { %v921_v56 = vmax.f32 %v574_v49, %v793_v51  ;;  %v922_v57 = vmax.f32 %v623_v50, %v794_v54 }
 0x1e3   : > { %v1024_v52 = vpack.c.bf16 %v916_v55, %v915_v2 }
 0x1e4   : > { %v1027_v58 = vpack.c.bf16 %v922_v57, %v921_v56 }
 0x1e5   : > { %1088 = vst [vmem:[%s1608_s26 + $0x98] sm:$0xff] %v1024_v52 }
 0x1e6   : > { %1091 = vst [vmem:[%s1608_s26 + $0xb0] sm:$0xff] %v1027_v58  ;;  %v672_v59 = vpop.f32.mrf.mxu2  ;;  %v721_v60 = vpop.f32.mrf.mxu3 }
 0x1e7   : > { %v795_v61 = vmul.f32 0.2, %v672_v59  ;;  %v796_v62 = vmul.f32 0.2, %v721_v60  ;;  %v577_v63 = vpop.f32.mrf.mxu0  ;;  %v626_v0 = vpop.f32.mrf.mxu1 }
 0x1e8   : > { %v801_v1 = vmul.f32 0.2, %v577_v63  ;;  %v802_v7 = vmul.f32 0.2, %v626_v0 }
 0x1e9   : > { %v923_v8 = vmax.f32 %v672_v59, %v795_v61  ;;  %v924_v9 = vmax.f32 %v721_v60, %v796_v62 }
 0x1ea   : > { %v929_v10 = vmax.f32 %v577_v63, %v801_v1  ;;  %v930_v11 = vmax.f32 %v626_v0, %v802_v7 }
 0x1eb   : > { %v1028_v12 = vpack.c.bf16 %v924_v9, %v923_v8 }
 0x1ec   : > { %v1031_v13 = vpack.c.bf16 %v930_v11, %v929_v10 }
 0x1ed   : > { %1092 = vst [vmem:[%s1608_s26 + $0xb8] sm:$0xff] %v1028_v12 }
 0x1ee   : > { %1095 = vst [vmem:[%s1608_s26 + $0xd0] sm:$0xff] %v1031_v13  ;;  %v675_v14 = vpop.f32.mrf.mxu2  ;;  %v724_v15 = vpop.f32.mrf.mxu3 }
 0x1ef   : > { %v803_v5 = vmul.f32 0.2, %v675_v14  ;;  %v804_v16 = vmul.f32 0.2, %v724_v15  ;;  %v579_v17 = vpop.f32.mrf.mxu0  ;;  %v628_v18 = vpop.f32.mrf.mxu1 }
 0x1f0   : > { %v809_v19 = vmul.f32 0.2, %v579_v17  ;;  %v810_v20 = vmul.f32 0.2, %v628_v18 }
 0x1f1   : > { %v931_v21 = vmax.f32 %v675_v14, %v803_v5  ;;  %v932_v3 = vmax.f32 %v724_v15, %v804_v16 }
 0x1f2   : > { %v937_v22 = vmax.f32 %v579_v17, %v809_v19  ;;  %v938_v23 = vmax.f32 %v628_v18, %v810_v20 }
 0x1f3   : > { %v1032_v24 = vpack.c.bf16 %v932_v3, %v931_v21 }
 0x1f4   : > { %v1035_v25 = vpack.c.bf16 %v938_v23, %v937_v22 }
 0x1f5   : > { %1096 = vst [vmem:[%s1608_s26 + $0xd8] sm:$0xff] %v1032_v24 }
 0x1f6   : > { %1099 = vst [vmem:[%s1608_s26 + $0xf0] sm:$0xff] %v1035_v25  ;;  %v677_v53 = vpop.f32.mrf.mxu2  ;;  %v726_v26 = vpop.f32.mrf.mxu3 }
 0x1f7   : > { %v811_v27 = vmul.f32 0.2, %v677_v53  ;;  %v812_v28 = vmul.f32 0.2, %v726_v26  ;;  %v582_v29 = vpop.f32.mrf.mxu0  ;;  %v631_v30 = vpop.f32.mrf.mxu1 }
 0x1f8   : > { %v817_v31 = vmul.f32 0.2, %v582_v29  ;;  %v818_v32 = vmul.f32 0.2, %v631_v30 }
 0x1f9   : > { %v939_v33 = vmax.f32 %v677_v53, %v811_v27  ;;  %v940_v34 = vmax.f32 %v726_v26, %v812_v28 }
 0x1fa   : > { %v945_v35 = vmax.f32 %v582_v29, %v817_v31  ;;  %v946_v36 = vmax.f32 %v631_v30, %v818_v32 }
 0x1fb   : > { %v1036_v37 = vpack.c.bf16 %v940_v34, %v939_v33 }
 0x1fc   : > { %v1039_v38 = vpack.c.bf16 %v946_v36, %v945_v35 }
 0x1fd   : > { %1100 = vst [vmem:[%s1608_s26 + $0xf8] sm:$0xff] %v1036_v37 }
 0x1fe   : > { %1103 = vst [vmem:[%s1608_s26 + $0x110] sm:$0xff] %v1039_v38  ;;  %v680_v39 = vpop.f32.mrf.mxu2  ;;  %v729_v40 = vpop.f32.mrf.mxu3 }
 0x1ff   : > { %v819_v6 = vmul.f32 0.2, %v680_v39  ;;  %v820_v41 = vmul.f32 0.2, %v729_v40  ;;  %v584_v42 = vpop.f32.mrf.mxu0  ;;  %v633_v43 = vpop.f32.mrf.mxu1 }
 0x200   : > { %v825_v44 = vmul.f32 0.2, %v584_v42  ;;  %v826_v45 = vmul.f32 0.2, %v633_v43 }
 0x201   : > { %v947_v46 = vmax.f32 %v680_v39, %v819_v6  ;;  %v948_v47 = vmax.f32 %v729_v40, %v820_v41 }
 0x202   : > { %v953_v4 = vmax.f32 %v584_v42, %v825_v44  ;;  %v954_v48 = vmax.f32 %v633_v43, %v826_v45 }
 0x203   : > { %v1040_v49 = vpack.c.bf16 %v948_v47, %v947_v46 }
 0x204   : > { %v1043_v50 = vpack.c.bf16 %v954_v48, %v953_v4 }
 0x205   : > { %1104 = vst [vmem:[%s1608_s26 + $0x118] sm:$0xff] %v1040_v49 }
 0x206   : > { %1107 = vst [vmem:[%s1608_s26 + $0x130] sm:$0xff] %v1043_v50  ;;  %v682_v51 = vpop.f32.mrf.mxu2  ;;  %v731_v54 = vpop.f32.mrf.mxu3 }
 0x207   : > { %v827_v2 = vmul.f32 0.2, %v682_v51  ;;  %v828_v55 = vmul.f32 0.2, %v731_v54  ;;  %v587_v56 = vpop.f32.mrf.mxu0  ;;  %v636_v57 = vpop.f32.mrf.mxu1 }
 0x208   : > { %v833_v52 = vmul.f32 0.2, %v587_v56  ;;  %v834_v58 = vmul.f32 0.2, %v636_v57 }
 0x209   : > { %v955_v59 = vmax.f32 %v682_v51, %v827_v2  ;;  %v956_v60 = vmax.f32 %v731_v54, %v828_v55 }
 0x20a   : > { %v961_v61 = vmax.f32 %v587_v56, %v833_v52  ;;  %v962_v62 = vmax.f32 %v636_v57, %v834_v58 }
 0x20b   : > { %v1044_v63 = vpack.c.bf16 %v956_v60, %v955_v59 }
 0x20c   : > { %v1047_v0 = vpack.c.bf16 %v962_v62, %v961_v61 }
 0x20d   : > { %1108 = vst [vmem:[%s1608_s26 + $0x138] sm:$0xff] %v1044_v63 }
 0x20e   : > { %1111 = vst [vmem:[%s1608_s26 + $0x150] sm:$0xff] %v1047_v0  ;;  %v685_v1 = vpop.f32.mrf.mxu2  ;;  %v734_v7 = vpop.f32.mrf.mxu3 }
 0x20f   : > { %v835_v8 = vmul.f32 0.2, %v685_v1  ;;  %v836_v9 = vmul.f32 0.2, %v734_v7  ;;  %v589_v10 = vpop.f32.mrf.mxu0  ;;  %v638_v11 = vpop.f32.mrf.mxu1 }
 0x210   : > { %v841_v12 = vmul.f32 0.2, %v589_v10  ;;  %v842_v13 = vmul.f32 0.2, %v638_v11 }
 0x211   : > { %v963_v14 = vmax.f32 %v685_v1, %v835_v8  ;;  %v964_v15 = vmax.f32 %v734_v7, %v836_v9 }
 0x212   : > { %v969_v5 = vmax.f32 %v589_v10, %v841_v12  ;;  %v970_v16 = vmax.f32 %v638_v11, %v842_v13 }
 0x213   : > { %v1048_v17 = vpack.c.bf16 %v964_v15, %v963_v14 }
 0x214   : > { %v1051_v18 = vpack.c.bf16 %v970_v16, %v969_v5 }
 0x215   : > { %1112 = vst [vmem:[%s1608_s26 + $0x158] sm:$0xff] %v1048_v17 }
 0x216   : > { %1115 = vst [vmem:[%s1608_s26 + $0x170] sm:$0xff] %v1051_v18  ;;  %v687_v19 = vpop.f32.mrf.mxu2  ;;  %v736_v20 = vpop.f32.mrf.mxu3 }
 0x217   : > { %v843_v21 = vmul.f32 0.2, %v687_v19  ;;  %v844_v3 = vmul.f32 0.2, %v736_v20  ;;  %v592_v22 = vpop.f32.mrf.mxu0  ;;  %v641_v23 = vpop.f32.mrf.mxu1 }
 0x218   : > { %v849_v24 = vmul.f32 0.2, %v592_v22  ;;  %v850_v25 = vmul.f32 0.2, %v641_v23 }
 0x219   : > { %v971_v53 = vmax.f32 %v687_v19, %v843_v21  ;;  %v972_v26 = vmax.f32 %v736_v20, %v844_v3 }
 0x21a   : > { %v977_v27 = vmax.f32 %v592_v22, %v849_v24  ;;  %v978_v28 = vmax.f32 %v641_v23, %v850_v25 }
 0x21b   : > { %v1052_v29 = vpack.c.bf16 %v972_v26, %v971_v53 }
 0x21c   : > { %v1055_v30 = vpack.c.bf16 %v978_v28, %v977_v27 }
 0x21d   : > { %1116 = vst [vmem:[%s1608_s26 + $0x178] sm:$0xff] %v1052_v29 }
 0x21e   : > { %1119 = vst [vmem:[%s1608_s26 + $0x190] sm:$0xff] %v1055_v30  ;;  %v690_v31 = vpop.f32.mrf.mxu2  ;;  %v739_v32 = vpop.f32.mrf.mxu3 }
 0x21f   : > { %v851_v33 = vmul.f32 0.2, %v690_v31  ;;  %v852_v34 = vmul.f32 0.2, %v739_v32  ;;  %v594_v35 = vpop.f32.mrf.mxu0  ;;  %v643_v36 = vpop.f32.mrf.mxu1 }
 0x220   : > { %v857_v37 = vmul.f32 0.2, %v594_v35  ;;  %v858_v38 = vmul.f32 0.2, %v643_v36 }
 0x221   : > { %v979_v39 = vmax.f32 %v690_v31, %v851_v33  ;;  %v980_v40 = vmax.f32 %v739_v32, %v852_v34 }
 0x222   : > { %v985_v6 = vmax.f32 %v594_v35, %v857_v37  ;;  %v986_v41 = vmax.f32 %v643_v36, %v858_v38 }
 0x223   : > { %v1056_v42 = vpack.c.bf16 %v980_v40, %v979_v39 }
 0x224   : > { %v1059_v43 = vpack.c.bf16 %v986_v41, %v985_v6 }
 0x225   : > { %1120 = vst [vmem:[%s1608_s26 + $0x198] sm:$0xff] %v1056_v42 }
 0x226   : > { %1123 = vst [vmem:[%s1608_s26 + $0x1b0] sm:$0xff] %v1059_v43  ;;  %v692_v44 = vpop.f32.mrf.mxu2  ;;  %v741_v45 = vpop.f32.mrf.mxu3 }
 0x227   : > { %v859_v46 = vmul.f32 0.2, %v692_v44  ;;  %v860_v47 = vmul.f32 0.2, %v741_v45  ;;  %v597_v4 = vpop.f32.mrf.mxu0  ;;  %v646_v48 = vpop.f32.mrf.mxu1 }
 0x228   : > { %v865_v49 = vmul.f32 0.2, %v597_v4  ;;  %v866_v50 = vmul.f32 0.2, %v646_v48 }
 0x229   : > { %v987_v51 = vmax.f32 %v692_v44, %v859_v46  ;;  %v988_v54 = vmax.f32 %v741_v45, %v860_v47 }
 0x22a   : > { %v993_v2 = vmax.f32 %v597_v4, %v865_v49  ;;  %v994_v55 = vmax.f32 %v646_v48, %v866_v50 }
 0x22b   : > { %v1060_v56 = vpack.c.bf16 %v988_v54, %v987_v51 }
 0x22c   : > { %v1063_v57 = vpack.c.bf16 %v994_v55, %v993_v2 }
 0x22d   : > { %1124 = vst [vmem:[%s1608_s26 + $0x1b8] sm:$0xff] %v1060_v56 }
 0x22e   : > { %1127 = vst [vmem:[%s1608_s26 + $0x1d0] sm:$0xff] %v1063_v57  ;;  %v695_v52 = vpop.f32.mrf.mxu2  ;;  %v744_v58 = vpop.f32.mrf.mxu3 }
 0x22f   : > { %v867_v59 = vmul.f32 0.2, %v695_v52  ;;  %v868_v60 = vmul.f32 0.2, %v744_v58  ;;  %v599_v61 = vpop.f32.mrf.mxu0  ;;  %v648_v62 = vpop.f32.mrf.mxu1 }
 0x230   : > { %v873_v63 = vmul.f32 0.2, %v599_v61  ;;  %v874_v0 = vmul.f32 0.2, %v648_v62 }
 0x231   : > { %v995_v1 = vmax.f32 %v695_v52, %v867_v59  ;;  %v996_v7 = vmax.f32 %v744_v58, %v868_v60 }
 0x232   : > { %v1001_v8 = vmax.f32 %v599_v61, %v873_v63  ;;  %v1002_v9 = vmax.f32 %v648_v62, %v874_v0 }
 0x233   : > { %v1064_v10 = vpack.c.bf16 %v996_v7, %v995_v1 }
 0x234   : > { %v1067_v11 = vpack.c.bf16 %v1002_v9, %v1001_v8 }
 0x235   : > { %1128 = vst [vmem:[%s1608_s26 + $0x1d8] sm:$0xff] %v1064_v10 }
 0x236   : > { %1131 = vst [vmem:[%s1608_s26 + $0x1f0] sm:$0xff] %v1067_v11  ;;  %v697_v12 = vpop.f32.mrf.mxu2  ;;  %v746_v13 = vpop.f32.mrf.mxu3 }
 0x237   : > { %v875_v14 = vmul.f32 0.2, %v697_v12  ;;  %v876_v15 = vmul.f32 0.2, %v746_v13 }
 0x239   : > { %v1003_v5 = vmax.f32 %v697_v12, %v875_v14  ;;  %v1004_v16 = vmax.f32 %v746_v13, %v876_v15 }
 0x23b   : > { %v1068_v17 = vpack.c.bf16 %v1004_v16, %v1003_v5 }
 0x23d   : > { %1132 = vst [vmem:[%s1608_s26 + $0x1f8] sm:$0xff] %v1068_v17 }
 0x23e PF: > { %s12_s11 = sadd.s32 1, %s1435_s11   ;;  %s1746_s9 = smov %s1431_s10 }
 0x23f   : > { %p9_p5 = scmp.ge.s32.totalorder %s12_s11, 4   ;;  %s1747_s10 = smov %s1749_s12 }
 0x241   :  { %11 = sbr.rel (!%p9_p5) target bundleno = 2 (0x2), region = 58 }

</bundles_post_ra>
